<compile_context>
chip_gen: v7x
topology: tpu7x:2x2x1
jax: 0.10.0
libtpu: 0.0.40
codegen_flags: <defaults>
</compile_context>

<pallas_src>
import functools

import jax
import jax.numpy as jnp
from jax.experimental import pallas as pl
from jax.experimental.pallas import tpu as pltpu

FLATTENED_DATA_SIZE = 54
MAX_BATCH_TILE = 4096  # rows per grid step; multiple of 8 (f32 sublane width)


def _mlp_kernel(num_hidden_layers, *refs):
    """Fused MLP forward for one batch tile.

    refs = (x_ref, w1, b1, w2, b2, ..., w_out, b_out, out_ref)
    Hidden layers apply ReLU; the final layer does not.
    """
    x_ref = refs[0]
    out_ref = refs[-1]
    wb_refs = refs[1:-1]
    n_layers = len(wb_refs) // 2  # num_hidden_layers + 1

    # Hoist all weight/bias loads before the layer loop (VMEM -> vregs once per tile).
    ws = [wb_refs[2 * i][...] for i in range(n_layers)]
    bs = [wb_refs[2 * i + 1][...] for i in range(n_layers)]  # each (1, out)

    h = x_ref[...]
    if h.dtype != jnp.float32:
        h = h.astype(jnp.float32)
    for i in range(n_layers):
        h = jnp.dot(h, ws[i], preferred_element_type=jnp.float32) + bs[i]
        if i < num_hidden_layers:  # ReLU only on hidden layers
            h = jnp.maximum(h, 0.0)
    out_ref[...] = h.astype(out_ref.dtype)


def dynamic_nn_forward(x, params, output_size):
    """x: any shape with total size divisible by FLATTENED_DATA_SIZE.
    params: list of (W, b) with W of shape (in, out), b of shape (1, out)."""
    x2d = jnp.reshape(x, (-1, FLATTENED_DATA_SIZE))  # mirrors x.view(-1, 54)
    batch = x2d.shape[0]

    num_hidden_layers = len(params) - 1
    kernel = functools.partial(_mlp_kernel, num_hidden_layers)

    # Batch tile: full batch if it fits one tile, else a big 8-aligned tile.
    tb = batch if batch <= MAX_BATCH_TILE else MAX_BATCH_TILE
    grid = (pl.cdiv(batch, tb),)

    flat_inputs = [x2d]
    in_specs = [pl.BlockSpec((tb, FLATTENED_DATA_SIZE), lambda i: (i, 0))]
    for w, b in params:
        flat_inputs.append(w)
        flat_inputs.append(b)
        # Weights/biases: full-array blocks with a constant index_map -> fetched once,
        # VMEM-resident across all grid steps.
        in_specs.append(pl.BlockSpec(w.shape, lambda i: (0, 0)))
        in_specs.append(pl.BlockSpec(b.shape, lambda i: (0, 0)))

    out_specs = pl.BlockSpec((tb, output_size), lambda i: (i, 0))

    # Advisory cost estimate (mem-bound kernel; helps XLA schedule neighbors).
    flops = 0
    bytes_accessed = x2d.size * x2d.dtype.itemsize
    for w, b in params:
        flops += 2 * batch * w.shape[0] * w.shape[1]
        bytes_accessed += w.size * w.dtype.itemsize + b.size * b.dtype.itemsize
    bytes_accessed += batch * output_size * 4  # f32 output

    out = pl.pallas_call(
        kernel,
        out_shape=jax.ShapeDtypeStruct((batch, output_size), jnp.float32),
        grid=grid,
        in_specs=in_specs,
        out_specs=out_specs,
        compiler_params=pltpu.CompilerParams(
            dimension_semantics=("parallel",)),  # v7x: shard batch over both TCs
        cost_estimate=pl.CostEstimate(
            flops=flops, transcendentals=0, bytes_accessed=bytes_accessed),
    )(*flat_inputs)
    return out


def init_params(key, input_size, output_size, config):
    """Deterministic init matching PyTorch nn.Linear shapes:
    uniform(-1/sqrt(fan_in), 1/sqrt(fan_in)) for both W and b."""
    params = []
    current_dim = input_size
    dims = []
    for _ in range(config["num_layers"]):
        dims.append((current_dim, config["hidden_size"]))
        current_dim = config["hidden_size"]
    dims.append((current_dim, output_size))

    for (fan_in, fan_out) in dims:
        key, kw, kb = jax.random.split(key, 3)
        bound = 1.0 / jnp.sqrt(jnp.float32(fan_in))
        w = jax.random.uniform(kw, (fan_in, fan_out), jnp.float32, -bound, bound)
        b = jax.random.uniform(kb, (1, fan_out), jnp.float32, -bound, bound)
        params.append((w, b))
    return params


def _reference(x, params):
    ref = jnp.reshape(x, (-1, FLATTENED_DATA_SIZE))
    for i, (w, b) in enumerate(params):
        ref = ref @ w + b
        if i < len(params) - 1:
            ref = jnp.maximum(ref, 0.0)
    return ref


if __name__ == "__main__":
    config = {"num_layers": 2, "hidden_size": 32, "dropout_rate": 0.0}
    input_size = FLATTENED_DATA_SIZE
    output_size = 3

    key = jax.random.PRNGKey(0)
    key, kx1, kx2 = jax.random.split(key, 3)
    params = init_params(key, input_size, output_size, config)

    # Case 1: small shape matching the module's view(-1, 54): (2,3,18) -> (2, 54)
    x_small = jax.random.normal(kx1, (2, 3, 18), jnp.float32)
    out_small = jax.block_until_ready(dynamic_nn_forward(x_small, params, output_size))
    ref_small = _reference(x_small, params)
    assert out_small.shape == (2, output_size), out_small.shape
    assert jnp.allclose(out_small, ref_small, atol=1e-5, rtol=1e-5)

    # Case 2: exercise the batch-tiled grid path with a partial tail tile
    # (4104 rows -> grid=(2,), second tile has 8 in-range rows).
    x_big = jax.random.normal(kx2, (4104, FLATTENED_DATA_SIZE), jnp.float32)
    out_big = jax.block_until_ready(dynamic_nn_forward(x_big, params, output_size))
    ref_big = _reference(x_big, params)
    assert out_big.shape == (4104, output_size), out_big.shape
    assert jnp.allclose(out_big, ref_big, atol=1e-5, rtol=1e-5)

    print("KERNEL_OK")
</pallas_src>

<mosaic_0001>
module attributes {stable_mosaic.version = 11 : i64} {
  func.func @_mlp_kernel(%arg0: i32, %arg1: memref<2x54xf32, #tpu.memory_space<vmem>>, %arg2: memref<54x32xf32, #tpu.memory_space<vmem>>, %arg3: memref<1x32xf32, #tpu.memory_space<vmem>>, %arg4: memref<32x32xf32, #tpu.memory_space<vmem>>, %arg5: memref<1x32xf32, #tpu.memory_space<vmem>>, %arg6: memref<32x3xf32, #tpu.memory_space<vmem>>, %arg7: memref<1x3xf32, #tpu.memory_space<vmem>>, %arg8: memref<2x3xf32, #tpu.memory_space<vmem>>) attributes {dimension_semantics = [#tpu.dimension_semantics<parallel>], iteration_bounds = array<i64: 1>, scalar_prefetch = 0 : i64, scratch_operands = 0 : i64, tpu.core_type = #tpu.core_type<tc>, window_params = [{transform_indices = @transform_0, window_bounds = array<i64: 2, 54>}, {pipeline_mode = #tpu.pipeline_mode<synchronous>, transform_indices = @transform_1, window_bounds = array<i64: 54, 32>}, {pipeline_mode = #tpu.pipeline_mode<synchronous>, transform_indices = @transform_2, window_bounds = array<i64: 1, 32>}, {pipeline_mode = #tpu.pipeline_mode<synchronous>, transform_indices = @transform_3, window_bounds = array<i64: 32, 32>}, {pipeline_mode = #tpu.pipeline_mode<synchronous>, transform_indices = @transform_4, window_bounds = array<i64: 1, 32>}, {pipeline_mode = #tpu.pipeline_mode<synchronous>, transform_indices = @transform_5, window_bounds = array<i64: 32, 3>}, {pipeline_mode = #tpu.pipeline_mode<synchronous>, transform_indices = @transform_6, window_bounds = array<i64: 1, 3>}, {transform_indices = @transform_7, window_bounds = array<i64: 2, 3>}]} {
    %c0 = arith.constant 0 : index
    %c0_0 = arith.constant 0 : index
    %0 = vector.load %arg2[%c0, %c0_0] : memref<54x32xf32, #tpu.memory_space<vmem>>, vector<54x32xf32>
    %c0_1 = arith.constant 0 : index
    %c0_2 = arith.constant 0 : index
    %1 = vector.load %arg4[%c0_1, %c0_2] : memref<32x32xf32, #tpu.memory_space<vmem>>, vector<32x32xf32>
    %c0_3 = arith.constant 0 : index
    %c0_4 = arith.constant 0 : index
    %2 = vector.load %arg6[%c0_3, %c0_4] : memref<32x3xf32, #tpu.memory_space<vmem>>, vector<32x3xf32>
    %c0_5 = arith.constant 0 : index
    %c0_6 = arith.constant 0 : index
    %3 = vector.load %arg3[%c0_5, %c0_6] : memref<1x32xf32, #tpu.memory_space<vmem>>, vector<1x32xf32>
    %c0_7 = arith.constant 0 : index
    %c0_8 = arith.constant 0 : index
    %4 = vector.load %arg5[%c0_7, %c0_8] : memref<1x32xf32, #tpu.memory_space<vmem>>, vector<1x32xf32>
    %c0_9 = arith.constant 0 : index
    %c0_10 = arith.constant 0 : index
    %5 = vector.load %arg7[%c0_9, %c0_10] : memref<1x3xf32, #tpu.memory_space<vmem>>, vector<1x3xf32>
    %c0_11 = arith.constant 0 : index
    %c0_12 = arith.constant 0 : index
    %6 = vector.load %arg1[%c0_11, %c0_12] : memref<2x54xf32, #tpu.memory_space<vmem>>, vector<2x54xf32>
    %cst = arith.constant dense<0.000000e+00> : vector<2x32xf32>
    %7 = tpu.matmul %6, %0, %cst {dimension_numbers = #tpu.dot_dimension_numbers<[1], [0], [0], [1], [0, 0, 1, 1], [], []>} : vector<2x54xf32>, vector<54x32xf32>, vector<2x32xf32> -> vector<2x32xf32>
    %8 = vector.broadcast %3 : vector<1x32xf32> to vector<2x32xf32>
    %9 = arith.addf %7, %8 : vector<2x32xf32>
    %cst_13 = arith.constant 0.000000e+00 : f32
    %10 = vector.broadcast %cst_13 : f32 to vector<2x32xf32>
    %11 = arith.maximumf %9, %10 : vector<2x32xf32>
    %cst_14 = arith.constant dense<0.000000e+00> : vector<2x32xf32>
    %12 = tpu.matmul %11, %1, %cst_14 {dimension_numbers = #tpu.dot_dimension_numbers<[1], [0], [0], [1], [0, 0, 1, 1], [], []>} : vector<2x32xf32>, vector<32x32xf32>, vector<2x32xf32> -> vector<2x32xf32>
    %13 = vector.broadcast %4 : vector<1x32xf32> to vector<2x32xf32>
    %14 = arith.addf %12, %13 : vector<2x32xf32>
    %cst_15 = arith.constant 0.000000e+00 : f32
    %15 = vector.broadcast %cst_15 : f32 to vector<2x32xf32>
    %16 = arith.maximumf %14, %15 : vector<2x32xf32>
    %cst_16 = arith.constant dense<0.000000e+00> : vector<2x3xf32>
    %17 = tpu.matmul %16, %2, %cst_16 {dimension_numbers = #tpu.dot_dimension_numbers<[1], [0], [0], [1], [0, 0, 1, 1], [], []>} : vector<2x32xf32>, vector<32x3xf32>, vector<2x3xf32> -> vector<2x3xf32>
    %18 = vector.broadcast %5 : vector<1x3xf32> to vector<2x3xf32>
    %19 = arith.addf %17, %18 : vector<2x3xf32>
    %c0_17 = arith.constant 0 : index
    %c0_18 = arith.constant 0 : index
    %20 = vector.load %arg8[%c0_17, %c0_18] : memref<2x3xf32, #tpu.memory_space<vmem>>, vector<2x3xf32>
    tpu.vector_store %arg8[%c0_17, %c0_18], %19 {strides = array<i32>} : memref<2x3xf32, #tpu.memory_space<vmem>>, vector<2x3xf32>,
    return
  }
  func.func @transform_0(%arg0: i32) -> (i32, i32) {
    %c0_i32 = arith.constant 0 : i32
    %c0_i32_0 = arith.constant 0 : i32
    return %arg0, %c0_i32 : i32, i32
  }
  func.func @transform_1(%arg0: i32) -> (i32, i32) {
    %c0_i32 = arith.constant 0 : i32
    %c0_i32_0 = arith.constant 0 : i32
    %c0_i32_1 = arith.constant 0 : i32
    return %c0_i32, %c0_i32_0 : i32, i32
  }
  func.func @transform_2(%arg0: i32) -> (i32, i32) {
    %c0_i32 = arith.constant 0 : i32
    %c0_i32_0 = arith.constant 0 : i32
    %c0_i32_1 = arith.constant 0 : i32
    return %c0_i32, %c0_i32_0 : i32, i32
  }
  func.func @transform_3(%arg0: i32) -> (i32, i32) {
    %c0_i32 = arith.constant 0 : i32
    %c0_i32_0 = arith.constant 0 : i32
    %c0_i32_1 = arith.constant 0 : i32
    return %c0_i32, %c0_i32_0 : i32, i32
  }
  func.func @transform_4(%arg0: i32) -> (i32, i32) {
    %c0_i32 = arith.constant 0 : i32
    %c0_i32_0 = arith.constant 0 : i32
    %c0_i32_1 = arith.constant 0 : i32
    return %c0_i32, %c0_i32_0 : i32, i32
  }
  func.func @transform_5(%arg0: i32) -> (i32, i32) {
    %c0_i32 = arith.constant 0 : i32
    %c0_i32_0 = arith.constant 0 : i32
    %c0_i32_1 = arith.constant 0 : i32
    return %c0_i32, %c0_i32_0 : i32, i32
  }
  func.func @transform_6(%arg0: i32) -> (i32, i32) {
    %c0_i32 = arith.constant 0 : i32
    %c0_i32_0 = arith.constant 0 : i32
    %c0_i32_1 = arith.constant 0 : i32
    return %c0_i32, %c0_i32_0 : i32, i32
  }
  func.func @transform_7(%arg0: i32) -> (i32, i32) {
    %c0_i32 = arith.constant 0 : i32
    %c0_i32_0 = arith.constant 0 : i32
    return %arg0, %c0_i32 : i32, i32
  }
}

</mosaic_0001>

<bundles_post_ra>
// kernel: tpu_custom_call.1
= control target key start
LH: loop header
LB: loop body
LE: loop exit
PB: predicated region body
PF: predicated region fallthrough
CT: control target
= control target key end

     0   :  { %v420_v3 = vmov 0.0|0.0   ;;  %vm421_vm0 = vmmov 0   ;;  %v422_v6 = vmov 0.0   ;;  %s538_s0 = inlined_call_operand.vmem [shape: f32[2,54], index: 0, kind: input, shape index: {}]   ;;  %s539_s1 = inlined_call_operand.vmem [shape: f32[54,32], index: 1, kind: input, shape index: {}]   ;;  %s540_s2 = inlined_call_operand.vmem [shape: f32[1,32], index: 2, kind: input, shape index: {}]   ;;  %s541_s3 = inlined_call_operand.vmem [shape: f32[32,32], index: 3, kind: input, shape index: {}]   ;;  %s542_s4 = inlined_call_operand.vmem [shape: f32[1,32], index: 4, kind: input, shape index: {}]   ;;  %s543_s5 = inlined_call_operand.vmem [shape: f32[32,3], index: 5, kind: input, shape index: {}]   ;;  %s544_s6 = inlined_call_operand.vmem [shape: f32[1,3], index: 6, kind: input, shape index: {}]   ;;  %s545_s7 = inlined_call_operand.hbm [shape: f32[2,3], index: 7, kind: output, shape index: {}]  }
   0x1   :  { %v27_v0 = vld [vmem:[%s539_s1] sm:$0xff]  ;;  %v28_v1 = vld [vmem:[%s539_s1 + $0x8] sm:$0xff]  ;;  %v29_v2 = vld [vmem:[%s539_s1 + $0x10] sm:$0xff]  ;;  %371 = vmatprep.subr.bf16.mxu0 %v420_v3  ;;  %380 = vmatprep.subr.bf16.mxu1 %v420_v3 }
   0x2   :  { %v372_v4 = vpack.c.bf16 %v28_v1, %v27_v0  ;;  %v30_v5 = vld [vmem:[%s539_s1 + $0x18] sm:$0xff]  ;;  %346 = vmatprep.mubr.msk.f32.mxu0 %vm421_vm0, %v422_v6  ;;  %v34_v7 = vld [vmem:[%s541_s3] sm:$0xff]  ;;  %357 = vmatprep.mubr.msk.f32.mxu1 %vm421_vm0, %v422_v6  ;;  %v35_v9 = vld [vmem:[%s541_s3 + $0x8] sm:$0xff] }
   0x3   :  { %v375_v8 = vpack.c.bf16 %v30_v5, %v29_v2 }
   0x4   :  { %373 = vmatpush3.bf16.msra.mxu0 %v372_v4 }
   0x5   :  { %12 = vsyncpa [#allocation3], 0  ;;  %374 = vmatprep.subr.bf16.mxu0 %v420_v3  ;;  %v31_v10 = vld [vmem:[%s539_s1 + $0x20] sm:$0xff]  ;;  %v32_v11 = vld [vmem:[%s539_s1 + $0x28] sm:$0xff]  ;;  %v381_v12 = vpack.c.bf16 %v35_v9, %v34_v7  ;;  %vm56_vm1 = vcmask 1045504   ;;  %vm52_vm2 = vcmask 441344  }
   0x6   :  { %v378_v13 = vpack.c.bf16 %v32_v11, %v31_v10  ;;  %v33_v14 = vld [vmem:[%s539_s1 + $0x30] sm:$0x3f]  ;;  %v45_v15 = vld [vmem:[%s538_s0] sm:$0x3]  ;;  %v37_v17 = vld [vmem:[%s541_s3 + $0x18] sm:$0xff]  ;;  %vm137_vm3 = vcmask 261120  }
   0x7   :  { %382 = vmatpush3.bf16.msra.mxu1 %v381_v12  ;;  %v36_v16 = vld [vmem:[%s541_s3 + $0x10] sm:$0xff]  ;;  %v307_v19 = vld [vmem:[%s540_s2] ss:$0 sm:$0xff]  ;;  %v39_v21 = vld [vmem:[%s543_s5 + $0x8] sm:$0xff]  ;;  %s423_s12 = smov [#allocation2]   ;;  %vm291_vm4 = vcmask 17408  }
   0x8   :  { %376 = vmatpush3.bf16.msra.mxu0 %v375_v8  ;;  %383 = vmatprep.subr.bf16.mxu1 %v420_v3  ;;  %v384_v18 = vpack.c.bf16 %v37_v17, %v36_v16  ;;  %v38_v20 = vld [vmem:[%s543_s5] sm:$0xff]  ;;  %v40_v27 = vld [vmem:[%s543_s5 + $0x10] sm:$0xff]  ;;  %v41_v28 = vld [vmem:[%s543_s5 + $0x18] sm:$0xff]  ;;  %s299_s13 = sshll.u32 %s423_s12, 4  ;;  %s300_s13 = int_to_ptr.vmem [resolvable:$true] %s299_s13 }
   0x9   :  { %377 = vmatprep.subr.bf16.mxu0 %v420_v3  ;;  %v387_v25 = vpack.c.bf16 %v39_v21, %v38_v20  ;;  %v390_v29 = vpack.c.bf16 %v41_v28, %v40_v27  ;;  %v310_v30 = vld [vmem:[%s542_s4] ss:$0 sm:$0xff]  ;;  %s396_s5 = scalar_lea.vmem %s300_s13, 32  ;;  %p401_p1 = scmp.lt.s32.totalorder %s300_s13, %s300_s13 }
   0xa   :  { %v312_v35 = vld [vmem:[%s544_s6] ss:$0 sm:$0xff]  ;;  %p397_p0 = scmp.ne.s32.totalorder %s300_s13, %s396_s5  ;;  %p402_p2 = scmp.lt.s32.totalorder %s396_s5, %s396_s5 }
   0xb   :  { %385 = vmatpush3.bf16.msra.mxu1 %v384_v18 }
   0xc   :  { %379 = vmatpush3.bf16.msra.mxu0 %v378_v13  ;;  %386 = vmatprep.subr.bf16.mxu1 %v420_v3  ;;  %p403_p3 = por %p402_p2, %p401_p1 }
   0xd   :  { %344 = vmatprep.subr.mxu0 %v422_v6 }
   0xe   :  { %p404_p4 = pnand %p403_p3, %p397_p0 }
  0x10   :  { %345 = vmatpush3.msk.msra.mxu0 %vm56_vm1, %v33_v14 }
  0x11   :  { %347 = vmatmul.mubr.msk.f32.vlgmr.msra.gmra.mrb[0].mxu0 %vm52_vm2, %v45_v15 }
  0xe4   :  { %v126_v22 = vpop.f32.mrb[0].mxu0 }
  0xe5   :  { %v127_v23 = vadd.f32 %v307_v19, %v126_v22  ;;  %v348_v24 = vpop.f32.mrb[1].mxu0 }
  0xe7   :  { %v130_v26 = vmax.f32 %v127_v23, 0.0 }
  0xe9   :  { %358 = vmatmul.mubr.msk.f32.vlgmr.msra.gmra.mrb[0].mxu1 %vm137_vm3, %v130_v26 }
  0xea   :  { %388 = vmatpush3.bf16.msra.mxu1 %v387_v25  ;;  %368 = vmatprep.mubr.msk.f32.mxu1 %vm421_vm0, %v422_v6 }
  0xeb   :  { %389 = vmatprep.subr.bf16.mxu1 %v420_v3 }
  0xee   :  { %391 = vmatpush3.bf16.msra.mxu1 %v390_v29 }
 0x1bc   :  { %v207_v31 = vpop.f32.mrb[0].mxu1 }
 0x1bd   :  { %v208_v32 = vadd.f32 %v310_v30, %v207_v31  ;;  %v359_v33 = vpop.f32.mrb[1].mxu1 }
 0x1bf   :  { %v211_v34 = vmax.f32 %v208_v32, 0.0 }
 0x1c1   :  { %369 = vmatmul.mubr.msk.f32.vlgmr.msra.gmra.mrb[2].mxu1 %vm137_vm3, %v211_v34 }
 0x294   :  { %v287_v36 = vpop.f32.mrb[2].mxu1 }
 0x295   :  { %v288_v37 = vadd.f32 %v312_v35, %v287_v36  ;;  %v370_v38 = vpop.f32.mrb[3].mxu1 }
 0x297   :  { %292 = vst.msk [vmem:[#allocation2] sm:$0x3] %vm291_vm4, %v288_v37 }
 0x298   :  { %407 = shalt.err (!%p404_p4)
}
 0x299   :  { %s408_s15 = scalar_lea.hbm %s545_s7, 32 }
 0x29a   :  { %p409_p5 = scmp.ne.s32.totalorder %s545_s7, %s408_s15  ;;  %p412_p6 = scmp.lt.u32.totalorder %s408_s15, %s545_s7 }
 0x29c   :  { %p414_p7 = pnand %p412_p6, %p409_p5 }
 0x29e   :  { %417 = shalt.err (!%p414_p7)
}
 0x29f   :  { %302 = dma.vmem_to_hbm [thread:$0]  %s300_s13, 32, %s545_s7, [#allocation3]  }
 0x2a0   :  { %418 = dma.done.wait [#allocation3], 32  }
 0x2a1   :  { %419 = vsyncadd [#allocation3], 4294967264 }
 0x2a2   :  { %306 = vsyncpa [#allocation3], 1 }

</bundles_post_ra>
